<compile_context>
chip_gen: v6e
topology: v6e:2x2x1
jax: 0.10.0
libtpu: 0.0.40
codegen_flags: <defaults>
</compile_context>

<pallas_src>
import functools

import jax
import jax.numpy as jnp
from jax.experimental import pallas as pl
from jax.experimental.pallas import tpu as pltpu


_HI = jax.lax.Precision.HIGHEST


def _round_up(a, b):
    return ((a + b - 1) // b) * b


def _encoder_affine_kernel(x_ref, w_ref, b_ref, out_ref):
    """One batch tile: packed rows (TMp, D*P) -> (TMp, P) results."""
    x = x_ref[...].astype(jnp.float32)                       # x.float()
    # Block-diagonal weight turns the per-row affine map into a single MXU
    # matmul whose P output columns are the P rows packed into each lane-row.
    y = jnp.dot(x, w_ref[...],
                preferred_element_type=jnp.float32, precision=_HI)
    out_ref[...] = y + b_ref[0]


def _collapse_affine(params, D):
    """Collapse layer_21/22/32 + concats into one (w_eff, b_eff).

    No activations exist in the module, so this is exact:
        out = x @ w_eff + b_eff
    """
    W21 = params["W21"].astype(jnp.float32)
    b21 = params["b21"].astype(jnp.float32)
    W22 = params["W22"].astype(jnp.float32)
    b22 = params["b22"].astype(jnp.float32)
    W32 = params["W32"].astype(jnp.float32)
    b32 = params["b32"].astype(jnp.float32)
    L1 = W22.shape[0]

    w21 = W21.T                    # (D, L0)
    w22_x = W22[:, :D].T           # (D, L1)   columns acting on x
    w22_h = W22[:, D:].T           # (L0, L1)  columns acting on h21
    w32_h22 = W32[:, :L1].T        # (L1, 1)
    w32_x = W32[:, L1:L1 + D].T    # (D, 1)
    w32_h21 = W32[:, L1 + D:].T    # (L0, 1)

    dot = functools.partial(jnp.dot, precision=_HI)

    a22 = w22_x + dot(w21, w22_h)                           # (D, L1)
    c22 = dot(b21, w22_h) + b22                             # (L1,)
    w_eff = dot(a22, w32_h22) + w32_x + dot(w21, w32_h21)   # (D, 1)
    b_eff = dot(c22, w32_h22) + dot(b21, w32_h21) + b32     # (1,)
    return w_eff, b_eff


@functools.partial(jax.jit, static_argnames=("tm",))
def encoder_beta_msi_forward(x, params, *, tm=65536):
    """Fused Encoder_Beta_MSI forward.

    x:      (N, D) array (cast like x.float()).
    params: PyTorch-convention weights:
            W21 (L0, D), b21 (L0,), W22 (L1, D+L0), b22 (L1,),
            W32 (1, D+L0+L1), b32 (1,).
    tm:     requested batch-tile size in *original* rows.
    """
    N, D = x.shape
    if x.dtype not in (jnp.float32, jnp.bfloat16):
        x = x.astype(jnp.float32)
    itemsize = jnp.dtype(x.dtype).itemsize
    sub = max(8, 32 // itemsize)          # sublane multiple: 8 f32 / 16 bf16

    w_eff, b_eff = _collapse_affine(params, D)     # (D, 1), (1,)
    b_sc = b_eff.reshape(1)                        # scalar bias in SMEM

    # ---- lane-dense packing of x -----------------------------------------
    # Fold P = 128 // D consecutive rows into one 128-lane row (contiguous
    # reshape).  Falls back to P = 1 when D does not divide 128.
    P = 128 // D if (D <= 128 and 128 % D == 0) else 1
    DP = D * P
    n_pad = _round_up(N, P)
    if n_pad != N:
        # Only a <=(P-1)-row alignment pad, and only when N % P != 0.
        x = jnp.pad(x, ((0, n_pad - N), (0, 0)))
    np_rows = n_pad // P
    xp = x.reshape(np_rows, DP)

    # Block-diagonal copy of w_eff: W_bd[r*D + d, r] = w_eff[d].
    w_bd = jnp.kron(jnp.eye(P, dtype=jnp.float32), w_eff)   # (DP, P)

    # ---- batch-tile sizing (in packed rows) -------------------------------
    # Per packed row in VMEM: x row (DP * itemsize) + lane-padded out row.
    row_bytes = DP * itemsize + 128 * 4
    budget = 24 * 1024 * 1024              # double-buffered tile budget
    cap = max(sub, (budget // (2 * row_bytes)) // sub * sub)
    tm_p = max(sub, _round_up(max(1, tm) // P, sub))
    tm_p = min(tm_p, cap)
    # Give the v7x megacore at least two grid steps when there is enough work.
    half = max(sub, _round_up(pl.cdiv(np_rows, 2), sub))
    tm_p = min(tm_p, half)
    grid = (pl.cdiv(np_rows, tm_p),)       # partial last block handled by Pallas

    cost = pl.CostEstimate(
        flops=2 * np_rows * DP * P,
        transcendentals=0,
        bytes_accessed=int(np_rows * DP * itemsize     # x stream
                           + np_rows * P * 4           # output
                           + DP * P * 4 + 4),          # weights + bias
    )

    out = pl.pallas_call(
        _encoder_affine_kernel,
        out_shape=jax.ShapeDtypeStruct((np_rows, P), jnp.float32),
        grid_spec=pl.GridSpec(
            grid=grid,
            in_specs=[
                pl.BlockSpec((tm_p, DP), lambda i: (i, 0)),           # packed x
                pl.BlockSpec((DP, P), lambda i: (0, 0)),              # w_bd
                pl.BlockSpec(memory_space=pltpu.MemorySpace.SMEM),    # b_eff
            ],
            out_specs=pl.BlockSpec((tm_p, P), lambda i: (i, 0)),
        ),
        compiler_params=pltpu.CompilerParams(
            dimension_semantics=("parallel",),
            vmem_limit_bytes=32 * 1024 * 1024,
        ),
        cost_estimate=cost,
    )(xp, w_bd, b_sc)

    return out.reshape(n_pad, 1)[:N]


def _reference_forward(x, params):
    """Pure-JAX mirror of the PyTorch forward (high-precision matmuls)."""
    dot = functools.partial(jnp.dot, precision=_HI)
    x = x.astype(jnp.float32)
    h21 = dot(x, params["W21"].T) + params["b21"]
    s21 = jnp.concatenate([x, h21], axis=1)
    h22 = dot(s21, params["W22"].T) + params["b22"]
    s22 = jnp.concatenate([h22, s21], axis=1)
    return dot(s22, params["W32"].T) + params["b32"]


def _init_params(key, D, L0, L1):
    """Deterministic synthetic init (PyTorch-Linear-style uniform bounds)."""
    ks = jax.random.split(key, 6)

    def lin(kw, kb, fan_in, fan_out):
        bound = 1.0 / jnp.sqrt(fan_in)
        W = jax.random.uniform(kw, (fan_out, fan_in), jnp.float32, -bound, bound)
        b = jax.random.uniform(kb, (fan_out,), jnp.float32, -bound, bound)
        return W, b

    W21, b21 = lin(ks[0], ks[1], D, L0)
    W22, b22 = lin(ks[2], ks[3], D + L0, L1)
    W32, b32 = lin(ks[4], ks[5], D + L0 + L1, 1)
    return {"W21": W21, "b21": b21, "W22": W22, "b22": b22,
            "W32": W32, "b32": b32}


if __name__ == "__main__":
    # Shapes implied by the module: dimHR=(16,16,16) -> D=16; nLRlevel=[32,16].
    D, L0, L1 = 16, 32, 16
    key = jax.random.PRNGKey(0)
    kx1, kx2, kx3, kp = jax.random.split(key, 4)
    params = _init_params(kp, D, L0, L1)

    ok = True

    # Case 1: tiny batch (single grid step, single packed block).
    x1 = jax.random.normal(kx1, (16, D), jnp.float32)
    out1 = jax.block_until_ready(encoder_beta_msi_forward(x1, params))
    ref1 = _reference_forward(x1, params)
    ok &= out1.shape == (16, 1)
    ok &= bool(jnp.allclose(out1, ref1, atol=2e-4, rtol=2e-4))

    # Case 2: batch not a multiple of P -> small alignment pad, multi-step
    # parallel grid with a partial final block.
    x2 = jax.random.normal(kx2, (300, D), jnp.float32)
    out2 = jax.block_until_ready(encoder_beta_msi_forward(x2, params, tm=128))
    ref2 = _reference_forward(x2, params)
    ok &= out2.shape == (300, 1)
    ok &= bool(jnp.allclose(out2, ref2, atol=2e-4, rtol=2e-4))

    # Case 3: bf16 input -> 16-row sublane rounding, in-kernel f32 cast.
    x3 = jax.random.normal(kx3, (256, D), jnp.float32).astype(jnp.bfloat16)
    out3 = jax.block_until_ready(encoder_beta_msi_forward(x3, params))
    ref3 = _reference_forward(x3, params)
    ok &= out3.shape == (256, 1)
    ok &= bool(jnp.allclose(out3, ref3, atol=2e-4, rtol=2e-4))

    assert ok, "mismatch vs reference"
    print("KERNEL_OK")
</pallas_src>

<mosaic_0001>
module attributes {stable_mosaic.version = 11 : i64} {
  func.func @_encoder_affine_kernel(%arg0: i32, %arg1: memref<8x128xf32, #tpu.memory_space<vmem>>, %arg2: memref<128x8xf32, #tpu.memory_space<vmem>>, %arg3: memref<1xf32, #tpu.memory_space<smem>>, %arg4: memref<8x8xf32, #tpu.memory_space<vmem>>) attributes {dimension_semantics = [#tpu.dimension_semantics<parallel>], iteration_bounds = array<i64: 1>, scalar_prefetch = 0 : i64, scratch_operands = 0 : i64, tpu.core_type = #tpu.core_type<tc>, window_params = [{transform_indices = @transform_0, window_bounds = array<i64: 8, 128>}, {pipeline_mode = #tpu.pipeline_mode<synchronous>, transform_indices = @transform_1, window_bounds = array<i64: 128, 8>}, {transform_indices = @transform_2, window_bounds = array<i64: 1>}, {transform_indices = @transform_3, window_bounds = array<i64: 8, 8>}]} {
    %c0 = arith.constant 0 : index
    %c0_0 = arith.constant 0 : index
    %0 = vector.load %arg1[%c0, %c0_0] : memref<8x128xf32, #tpu.memory_space<vmem>>, vector<8x128xf32>
    %c0_1 = arith.constant 0 : index
    %c0_2 = arith.constant 0 : index
    %1 = vector.load %arg2[%c0_1, %c0_2] : memref<128x8xf32, #tpu.memory_space<vmem>>, vector<128x8xf32>
    %cst = arith.constant dense<0.000000e+00> : vector<8x8xf32>
    %2 = tpu.matmul %0, %1, %cst {dimension_numbers = #tpu.dot_dimension_numbers<[1], [0], [0], [1], [0, 0, 1, 1], [], []>, precision = #tpu.contract_precision<fp32>} : vector<8x128xf32>, vector<128x8xf32>, vector<8x8xf32> -> vector<8x8xf32>
    %c0_3 = arith.constant 0 : index
    %3 = memref.load %arg3[%c0_3] : memref<1xf32, #tpu.memory_space<smem>>
    %4 = vector.broadcast %3 : f32 to vector<8x8xf32>
    %5 = arith.addf %2, %4 : vector<8x8xf32>
    %c0_4 = arith.constant 0 : index
    %c0_5 = arith.constant 0 : index
    %6 = vector.load %arg4[%c0_4, %c0_5] : memref<8x8xf32, #tpu.memory_space<vmem>>, vector<8x8xf32>
    tpu.vector_store %arg4[%c0_4, %c0_5], %5 {strides = array<i32>} : memref<8x8xf32, #tpu.memory_space<vmem>>, vector<8x8xf32>,
    return
  }
  func.func @transform_0(%arg0: i32) -> (i32, i32) {
    %c0_i32 = arith.constant 0 : i32
    %c0_i32_0 = arith.constant 0 : i32
    return %arg0, %c0_i32 : i32, i32
  }
  func.func @transform_1(%arg0: i32) -> (i32, i32) {
    %c0_i32 = arith.constant 0 : i32
    %c0_i32_0 = arith.constant 0 : i32
    %c0_i32_1 = arith.constant 0 : i32
    return %c0_i32, %c0_i32_0 : i32, i32
  }
  func.func @transform_2(%arg0: i32) -> i32 {
    %c0_i32 = arith.constant 0 : i32
    %c0_i32_0 = arith.constant 0 : i32
    return %c0_i32 : i32
  }
  func.func @transform_3(%arg0: i32) -> (i32, i32) {
    %c0_i32 = arith.constant 0 : i32
    %c0_i32_0 = arith.constant 0 : i32
    return %arg0, %c0_i32 : i32, i32
  }
}

</mosaic_0001>

<bundles_post_ra>
// kernel: encoder_beta_msi_forward.1
= control target key start
LH: loop header
LB: loop body
LE: loop exit
PB: predicated region body
PF: predicated region fallthrough
CT: control target
= control target key end

     0   :  { %v1032_v3 = vmov 0.0   ;;  %vm1033_vm0 = vmmov 0   ;;  %vm675_vm1 = vcmask 64512   ;;  %s1474_s0 = inlined_call_operand.vmem [shape: f32[2,128], index: 0, kind: input, shape index: {}]   ;;  %s1475_s1 = inlined_call_operand.vmem [shape: f32[128,8], index: 1, kind: input, shape index: {}]   ;;  %s1476_s2 = inlined_call_operand.<no memory space> [shape: f32[1], index: 2, kind: input, shape index: {}]   ;;  %s1477_s3 = inlined_call_operand.vmem [shape: f32[2,8], index: 3, kind: output, shape index: {}]  }
   0x1   :  { %v31_v0 = vld [vmem:[%s1475_s1 + $0x78] sm:$0xff]  ;;  %v30_v1 = vld [vmem:[%s1475_s1 + $0x70] sm:$0xff]  ;;  %v29_v2 = vld [vmem:[%s1475_s1 + $0x68] sm:$0xff]  ;;  %820 = vmatprep.subr.mxu0 %v1032_v3  ;;  %855 = vmatprep.subr.mxu1 %v1032_v3 }
   0x2   :  { %v1064_v4 = vand.u32 4294901760, %v31_v0  ;;  %v1066_v5 = vand.u32 4294901760, %v30_v1  ;;  %v1068_v6 = vand.u32 4294901760, %v29_v2  ;;  %v28_v7 = vld [vmem:[%s1475_s1 + $0x60] sm:$0xff]  ;;  %v27_v8 = vld [vmem:[%s1475_s1 + $0x58] sm:$0xff]  ;;  %v26_v9 = vld [vmem:[%s1475_s1 + $0x50] sm:$0xff]  ;;  %852 = vmatprep.mubr.msk.f32.mxu0 %vm1033_vm0, %v1032_v3  ;;  %887 = vmatprep.mubr.msk.f32.mxu1 %vm1033_vm0, %v1032_v3 }
   0x3   :  { %v1080_v10 = vand.u32 4294901760, %v28_v7  ;;  %v1082_v11 = vand.u32 4294901760, %v27_v8  ;;  %v1084_v12 = vand.u32 4294901760, %v26_v9  ;;  %v25_v13 = vld [vmem:[%s1475_s1 + $0x48] sm:$0xff]  ;;  %v24_v14 = vld [vmem:[%s1475_s1 + $0x40] sm:$0xff]  ;;  %v23_v19 = vld [vmem:[%s1475_s1 + $0x38] sm:$0xff] }
   0x4   :  { %821 = vmatpush3.msra.mxu0 %v1064_v4  ;;  %v1098_v15 = vsub.f32 %v31_v0, %v1064_v4  ;;  %v1101_v16 = vsub.f32 %v30_v1, %v1066_v5  ;;  %v1103_v17 = vand.u32 4294901760, %v25_v13  ;;  %v1106_v18 = vsub.f32 %v29_v2, %v1068_v6  ;;  %v22_v26 = vld [vmem:[%s1475_s1 + $0x30] sm:$0xff]  ;;  %v21_v36 = vld [vmem:[%s1475_s1 + $0x28] sm:$0xff]  ;;  %v20_v41 = vld [vmem:[%s1475_s1 + $0x20] sm:$0xff] }
   0x5   :  { %822 = vmatprep.subr.mxu0 %v1032_v3  ;;  %v1113_v20 = vsub.f32 %v28_v7, %v1080_v10  ;;  %v1116_v21 = vsub.f32 %v27_v8, %v1082_v11  ;;  %v1122_v25 = vand.u32 4294901760, %v24_v14  ;;  %v1129_v28 = vand.u32 4294901760, %v23_v19  ;;  %v19_v49 = vld [vmem:[%s1475_s1 + $0x18] sm:$0xff]  ;;  %v15_v50 = vld [vmem:[%s1474_s0] sm:$0xff]  ;;  %v18_v54 = vld [vmem:[%s1475_s1 + $0x10] sm:$0xff] }
   0x6   :  { %823 = vmatpush3.msra.mxu0 %v1066_v5  ;;  %v128_v22 = vand.u32 4294901760, %v1098_v15  ;;  %v135_v23 = vand.u32 4294901760, %v1101_v16  ;;  %v142_v24 = vand.u32 4294901760, %v1106_v18  ;;  %v1133_v30 = vsub.f32 %v26_v9, %v1084_v12  ;;  %v17_v60 = vld [vmem:[%s1475_s1 + $0x8] sm:$0xff]  ;;  %v16_v7 = vld [vmem:[%s1475_s1] sm:$0xff] }
   0x7   :  { %824 = vmatprep.subr.mxu0 %v1032_v3  ;;  %v149_v27 = vand.u32 4294901760, %v1113_v20  ;;  %v156_v29 = vand.u32 4294901760, %v1116_v21  ;;  %v1146_v34 = vsub.f32 %v25_v13, %v1103_v17  ;;  %v1149_v35 = vand.u32 4294901760, %v22_v26 }
   0x8   :  { %825 = vmatpush3.msra.mxu0 %v1068_v6  ;;  %v129_v31 = vsub.f32 %v1098_v15, %v128_v22  ;;  %v136_v32 = vsub.f32 %v1101_v16, %v135_v23  ;;  %v143_v33 = vsub.f32 %v1106_v18, %v142_v24  ;;  %v163_v40 = vand.u32 4294901760, %v1133_v30 }
   0x9   :  { %826 = vmatprep.subr.mxu0 %v1032_v3  ;;  %v150_v39 = vsub.f32 %v1113_v20, %v149_v27  ;;  %v157_v42 = vsub.f32 %v1116_v21, %v156_v29  ;;  %v1167_v43 = vsub.f32 %v24_v14, %v1122_v25  ;;  %v1170_v45 = vand.u32 4294901760, %v21_v36 }
   0xa   :  { %827 = vmatpush3.msra.mxu0 %v1080_v10  ;;  %v130_v37 = vand.u32 4294901760, %v129_v31  ;;  %v137_v38 = vand.u32 4294901760, %v136_v32  ;;  %v144_v44 = vand.u32 4294901760, %v143_v33  ;;  %v170_v46 = vand.u32 4294901760, %v1146_v34 }
   0xb   :  { %828 = vmatprep.subr.mxu0 %v1032_v3  ;;  %v1174_v47 = vsub.f32 %v23_v19, %v1129_v28  ;;  %v1178_v48 = vand.u32 4294901760, %v20_v41  ;;  %v151_v51 = vand.u32 4294901760, %v150_v39  ;;  %v164_v52 = vsub.f32 %v1133_v30, %v163_v40 }
   0xc   :  { %829 = vmatpush3.msra.mxu0 %v1082_v11  ;;  %856 = vmatpush3.msra.mxu1 %v130_v37  ;;  %v177_v53 = vand.u32 4294901760, %v1167_v43  ;;  %v1195_v55 = vsub.f32 %v22_v26, %v1149_v35  ;;  %v158_v56 = vand.u32 4294901760, %v157_v42  ;;  %v171_v58 = vsub.f32 %v1146_v34, %v170_v46 }
   0xd   :  { %830 = vmatprep.subr.mxu0 %v1032_v3  ;;  %857 = vmatprep.subr.mxu1 %v1032_v3  ;;  %v184_v57 = vand.u32 4294901760, %v1174_v47  ;;  %v1204_v59 = vand.u32 4294901760, %v19_v49  ;;  %v1210_v61 = vsub.f32 %v21_v36, %v1170_v45  ;;  %v1212_v62 = vand.u32 4294901760, %v15_v50 }
   0xe   :  { %831 = vmatpush3.msra.mxu0 %v1084_v12  ;;  %858 = vmatpush3.msra.mxu1 %v137_v38  ;;  %v1216_v63 = vand.u32 4294901760, %v18_v54  ;;  %v165_v0 = vand.u32 4294901760, %v164_v52  ;;  %v178_v1 = vsub.f32 %v1167_v43, %v177_v53  ;;  %v191_v2 = vand.u32 4294901760, %v1195_v55 }
   0xf   :  { %832 = vmatprep.subr.mxu0 %v1032_v3  ;;  %859 = vmatprep.subr.mxu1 %v1032_v3  ;;  %v1227_v8 = vsub.f32 %v20_v41, %v1178_v48  ;;  %v185_v9 = vsub.f32 %v1174_v47, %v184_v57  ;;  %v1234_v13 = vand.u32 4294901760, %v17_v60  ;;  %v172_v14 = vand.u32 4294901760, %v171_v58 }
  0x10   :  { %833 = vmatpush3.msra.mxu0 %v1103_v17  ;;  %860 = vmatpush3.msra.mxu1 %v144_v44  ;;  %v198_v19 = vand.u32 4294901760, %v1210_v61  ;;  %v1239_v26 = vsub.f32 %v15_v50, %v1212_v62  ;;  %v1242_v31 = vsub.f32 %v19_v49, %v1204_v59  ;;  %v1246_v32 = vand.u32 4294901760, %v16_v7 }
  0x11   :  { %834 = vmatprep.subr.mxu0 %v1032_v3  ;;  %861 = vmatprep.subr.mxu1 %v1032_v3  ;;  %v179_v33 = vand.u32 4294901760, %v178_v1  ;;  %v192_v36 = vsub.f32 %v1195_v55, %v191_v2  ;;  %v205_v37 = vand.u32 4294901760, %v1227_v8  ;;  %v1254_v38 = vsub.f32 %v18_v54, %v1216_v63 }
  0x12   :  { %835 = vmatpush3.msra.mxu0 %v1122_v25  ;;  %862 = vmatpush3.msra.mxu1 %v151_v51  ;;  %v186_v39 = vand.u32 4294901760, %v185_v9  ;;  %v199_v41 = vsub.f32 %v1210_v61, %v198_v19  ;;  %v117_v42 = vand.u32 4294901760, %v1239_v26  ;;  %v212_v44 = vand.u32 4294901760, %v1242_v31 }
  0x13   :  { %836 = vmatprep.subr.mxu0 %v1032_v3  ;;  %863 = vmatprep.subr.mxu1 %v1032_v3  ;;  %v1265_v49 = vsub.f32 %v17_v60, %v1234_v13  ;;  %v193_v50 = vand.u32 4294901760, %v192_v36  ;;  %v206_v51 = vsub.f32 %v1227_v8, %v205_v37  ;;  %v219_v52 = vand.u32 4294901760, %v1254_v38 }
  0x14   :  { %837 = vmatpush3.msra.mxu0 %v1129_v28  ;;  %864 = vmatpush3.msra.mxu1 %v158_v56  ;;  %v1275_v54 = vsub.f32 %v16_v7, %v1246_v32  ;;  %v200_v56 = vand.u32 4294901760, %v199_v41  ;;  %v118_v58 = vsub.f32 %v1239_v26, %v117_v42  ;;  %v213_v60 = vsub.f32 %v1242_v31, %v212_v44 }
  0x15   :  { %838 = vmatprep.subr.mxu0 %v1032_v3  ;;  %865 = vmatprep.subr.mxu1 %v1032_v3  ;;  %v207_v1 = vand.u32 4294901760, %v206_v51  ;;  %v220_v7 = vsub.f32 %v1254_v38, %v219_v52 }
  0x16   :  { %839 = vmatpush3.msra.mxu0 %v1149_v35  ;;  %866 = vmatpush3.msra.mxu1 %v165_v0  ;;  %v226_v0 = vand.u32 4294901760, %v1265_v49  ;;  %v233_v9 = vand.u32 4294901760, %v1275_v54 }
  0x17   :  { %840 = vmatprep.subr.mxu0 %v1032_v3  ;;  %867 = vmatprep.subr.mxu1 %v1032_v3 }
  0x18   :  { %841 = vmatpush3.msra.mxu0 %v1170_v45  ;;  %868 = vmatpush3.msra.mxu1 %v172_v14  ;;  %v119_v14 = vand.u32 4294901760, %v118_v58  ;;  %v227_v36 = vsub.f32 %v1265_v49, %v226_v0  ;;  %v234_v41 = vsub.f32 %v1275_v54, %v233_v9 }
  0x19   :  { %842 = vmatprep.subr.mxu0 %v1032_v3  ;;  %869 = vmatprep.subr.mxu1 %v1032_v3 }
  0x1a   :  { %843 = vmatpush3.msra.mxu0 %v1178_v48  ;;  %870 = vmatpush3.msra.mxu1 %v179_v33  ;;  %v214_v33 = vand.u32 4294901760, %v213_v60  ;;  %v235_v51 = vand.u32 4294901760, %v234_v41 }
  0x1b   :  { %844 = vmatprep.subr.mxu0 %v1032_v3  ;;  %871 = vmatprep.subr.mxu1 %v1032_v3 }
  0x1c   :  { %845 = vmatpush3.msra.mxu0 %v1204_v59  ;;  %872 = vmatpush3.msra.mxu1 %v186_v39  ;;  %v221_v39 = vand.u32 4294901760, %v220_v7 }
  0x1d   :  { %846 = vmatprep.subr.mxu0 %v1032_v3  ;;  %873 = vmatprep.subr.mxu1 %v1032_v3 }
  0x1e   :  { %847 = vmatpush3.msra.mxu0 %v1216_v63  ;;  %874 = vmatpush3.msra.mxu1 %v193_v50  ;;  %v228_v50 = vand.u32 4294901760, %v227_v36 }
  0x1f   :  { %848 = vmatprep.subr.mxu0 %v1032_v3  ;;  %875 = vmatprep.subr.mxu1 %v1032_v3 }
  0x20   :  { %849 = vmatpush3.msra.mxu0 %v1234_v13  ;;  %876 = vmatpush3.msra.mxu1 %v200_v56 }
  0x21   :  { %850 = vmatprep.subr.mxu0 %v1032_v3  ;;  %877 = vmatprep.subr.mxu1 %v1032_v3 }
  0x22   :  { %851 = vmatpush3.msra.mxu0 %v1246_v32  ;;  %878 = vmatpush3.msra.mxu1 %v207_v1 }
  0x23   :  { %879 = vmatprep.subr.mxu1 %v1032_v3  ;;  %890 = vmatprep.subr.mxu0 %v1032_v3 }
  0x24   :  { %853 = vmatmul.mubr.f32.vlgmr.msra.gmra.mxu0 %v119_v14  ;;  %880 = vmatpush3.msra.mxu1 %v214_v33 }
  0x25   :  { %891 = vmatpush3.msra.mxu0 %v1098_v15  ;;  %881 = vmatprep.subr.mxu1 %v1032_v3 }
  0x26   :  { %892 = vmatprep.subr.mxu0 %v1032_v3  ;;  %882 = vmatpush3.msra.mxu1 %v221_v39 }
  0x27   :  { %893 = vmatpush3.msra.mxu0 %v1101_v16  ;;  %883 = vmatprep.subr.mxu1 %v1032_v3 }
  0x28   :  { %894 = vmatprep.subr.mxu0 %v1032_v3  ;;  %884 = vmatpush3.msra.mxu1 %v228_v50 }
  0x29   :  { %895 = vmatpush3.msra.mxu0 %v1106_v18  ;;  %885 = vmatprep.subr.mxu1 %v1032_v3 }
  0x2a   :  { %896 = vmatprep.subr.mxu0 %v1032_v3  ;;  %886 = vmatpush3.msra.mxu1 %v235_v51 }
  0x2b   :  { %897 = vmatpush3.msra.mxu0 %v1113_v20  ;;  %888 = vmatmul.mubr.f32.vlgmr.msra.gmra.mxu1 %v1212_v62 }
  0x2c   :  { %898 = vmatprep.subr.mxu0 %v1032_v3  ;;  %925 = vmatprep.subr.mxu1 %v1032_v3 }
  0x2d   :  { %899 = vmatpush3.msra.mxu0 %v1116_v21  ;;  %926 = vmatpush3.msra.mxu1 %v1064_v4 }
  0x2e   :  { %900 = vmatprep.subr.mxu0 %v1032_v3  ;;  %927 = vmatprep.subr.mxu1 %v1032_v3 }
  0x2f   :  { %901 = vmatpush3.msra.mxu0 %v1133_v30  ;;  %928 = vmatpush3.msra.mxu1 %v1066_v5 }
  0x30   :  { %902 = vmatprep.subr.mxu0 %v1032_v3  ;;  %929 = vmatprep.subr.mxu1 %v1032_v3 }
  0x31   :  { %903 = vmatpush3.msra.mxu0 %v1146_v34  ;;  %930 = vmatpush3.msra.mxu1 %v1068_v6 }
  0x32   :  { %904 = vmatprep.subr.mxu0 %v1032_v3  ;;  %931 = vmatprep.subr.mxu1 %v1032_v3 }
  0x33   :  { %905 = vmatpush3.msra.mxu0 %v1167_v43  ;;  %932 = vmatpush3.msra.mxu1 %v1080_v10 }
  0x34   :  { %906 = vmatprep.subr.mxu0 %v1032_v3  ;;  %933 = vmatprep.subr.mxu1 %v1032_v3 }
  0x35   :  { %907 = vmatpush3.msra.mxu0 %v1174_v47  ;;  %934 = vmatpush3.msra.mxu1 %v1082_v11 }
  0x36   :  { %908 = vmatprep.subr.mxu0 %v1032_v3  ;;  %935 = vmatprep.subr.mxu1 %v1032_v3 }
  0x37   :  { %909 = vmatpush3.msra.mxu0 %v1195_v55  ;;  %936 = vmatpush3.msra.mxu1 %v1084_v12 }
  0x38   :  { %910 = vmatprep.subr.mxu0 %v1032_v3  ;;  %937 = vmatprep.subr.mxu1 %v1032_v3 }
  0x39   :  { %911 = vmatpush3.msra.mxu0 %v1210_v61  ;;  %938 = vmatpush3.msra.mxu1 %v1103_v17 }
  0x3a   :  { %912 = vmatprep.subr.mxu0 %v1032_v3  ;;  %939 = vmatprep.subr.mxu1 %v1032_v3 }
  0x3b   :  { %913 = vmatpush3.msra.mxu0 %v1227_v8  ;;  %940 = vmatpush3.msra.mxu1 %v1122_v25 }
  0x3c   :  { %914 = vmatprep.subr.mxu0 %v1032_v3  ;;  %941 = vmatprep.subr.mxu1 %v1032_v3 }
  0x3d   :  { %915 = vmatpush3.msra.mxu0 %v1242_v31  ;;  %942 = vmatpush3.msra.mxu1 %v1129_v28 }
  0x3e   :  { %916 = vmatprep.subr.mxu0 %v1032_v3  ;;  %943 = vmatprep.subr.mxu1 %v1032_v3 }
  0x3f   :  { %917 = vmatpush3.msra.mxu0 %v1254_v38  ;;  %944 = vmatpush3.msra.mxu1 %v1149_v35 }
  0x40   :  { %918 = vmatprep.subr.mxu0 %v1032_v3  ;;  %945 = vmatprep.subr.mxu1 %v1032_v3 }
  0x41   :  { %919 = vmatpush3.msra.mxu0 %v1265_v49  ;;  %946 = vmatpush3.msra.mxu1 %v1170_v45 }
  0x42   :  { %920 = vmatprep.subr.mxu0 %v1032_v3  ;;  %947 = vmatprep.subr.mxu1 %v1032_v3 }
  0x43   :  { %921 = vmatpush3.msra.mxu0 %v1275_v54  ;;  %922 = vmatprep.mubr.msk.f32.mxu0 %vm1033_vm0, %v1032_v3 }
  0x44   :  { %948 = vmatpush3.msra.mxu1 %v1178_v48  ;;  %923 = vmatmul.mubr.f32.vlgmr.msra.gmra.mxu0 %v1239_v26 }
  0x45   :  { %949 = vmatprep.subr.mxu1 %v1032_v3  ;;  %960 = vmatprep.subr.mxu0 %v1032_v3 }
  0x46   :  { %950 = vmatpush3.msra.mxu1 %v1204_v59  ;;  %961 = vmatpush3.msra.mxu0 %v128_v22 }
  0x47   :  { %951 = vmatprep.subr.mxu1 %v1032_v3  ;;  %962 = vmatprep.subr.mxu0 %v1032_v3 }
  0x48   :  { %952 = vmatpush3.msra.mxu1 %v1216_v63  ;;  %963 = vmatpush3.msra.mxu0 %v135_v23 }
  0x49   :  { %953 = vmatprep.subr.mxu1 %v1032_v3  ;;  %964 = vmatprep.subr.mxu0 %v1032_v3 }
  0x4a   :  { %954 = vmatpush3.msra.mxu1 %v1234_v13  ;;  %965 = vmatpush3.msra.mxu0 %v142_v24 }
  0x4b   :  { %955 = vmatprep.subr.mxu1 %v1032_v3  ;;  %966 = vmatprep.subr.mxu0 %v1032_v3 }
  0x4c   :  { %956 = vmatpush3.msra.mxu1 %v1246_v32  ;;  %957 = vmatprep.mubr.msk.f32.mxu1 %vm1033_vm0, %v1032_v3 }
  0x4d   :  { %967 = vmatpush3.msra.mxu0 %v149_v27  ;;  %958 = vmatmul.mubr.f32.vlgmr.msra.gmra.mxu1 %v117_v42 }
  0x4e   :  { %968 = vmatprep.subr.mxu0 %v1032_v3  ;;  %995 = vmatprep.subr.mxu1 %v1032_v3 }
  0x4f   :  { %969 = vmatpush3.msra.mxu0 %v156_v29  ;;  %996 = vmatpush3.msra.mxu1 %v1064_v4 }
  0x50   :  { %970 = vmatprep.subr.mxu0 %v1032_v3  ;;  %997 = vmatprep.subr.mxu1 %v1032_v3 }
  0x51   :  { %971 = vmatpush3.msra.mxu0 %v163_v40  ;;  %998 = vmatpush3.msra.mxu1 %v1066_v5 }
  0x52   :  { %972 = vmatprep.subr.mxu0 %v1032_v3  ;;  %999 = vmatprep.subr.mxu1 %v1032_v3 }
  0x53   :  { %973 = vmatpush3.msra.mxu0 %v170_v46  ;;  %1000 = vmatpush3.msra.mxu1 %v1068_v6 }
  0x54   :  { %974 = vmatprep.subr.mxu0 %v1032_v3  ;;  %1001 = vmatprep.subr.mxu1 %v1032_v3 }
  0x55   :  { %975 = vmatpush3.msra.mxu0 %v177_v53  ;;  %1002 = vmatpush3.msra.mxu1 %v1080_v10 }
  0x56   :  { %976 = vmatprep.subr.mxu0 %v1032_v3  ;;  %1003 = vmatprep.subr.mxu1 %v1032_v3 }
  0x57   :  { %977 = vmatpush3.msra.mxu0 %v184_v57  ;;  %1004 = vmatpush3.msra.mxu1 %v1082_v11 }
  0x58   :  { %978 = vmatprep.subr.mxu0 %v1032_v3  ;;  %1005 = vmatprep.subr.mxu1 %v1032_v3 }
  0x59   :  { %979 = vmatpush3.msra.mxu0 %v191_v2  ;;  %1006 = vmatpush3.msra.mxu1 %v1084_v12 }
  0x5a   :  { %980 = vmatprep.subr.mxu0 %v1032_v3  ;;  %1007 = vmatprep.subr.mxu1 %v1032_v3 }
  0x5b   :  { %981 = vmatpush3.msra.mxu0 %v198_v19  ;;  %1008 = vmatpush3.msra.mxu1 %v1103_v17  ;;  %v33_v17 = vstv %s1476_s2 }
  0x5c   :  { %982 = vmatprep.subr.mxu0 %v1032_v3  ;;  %1009 = vmatprep.subr.mxu1 %v1032_v3 }
  0x5d   :  { %983 = vmatpush3.msra.mxu0 %v205_v37  ;;  %1010 = vmatpush3.msra.mxu1 %v1122_v25 }
  0x5e   :  { %984 = vmatprep.subr.mxu0 %v1032_v3  ;;  %1011 = vmatprep.subr.mxu1 %v1032_v3 }
  0x5f   :  { %985 = vmatpush3.msra.mxu0 %v212_v44  ;;  %1012 = vmatpush3.msra.mxu1 %v1129_v28 }
  0x60   :  { %986 = vmatprep.subr.mxu0 %v1032_v3  ;;  %1013 = vmatprep.subr.mxu1 %v1032_v3 }
  0x61   :  { %987 = vmatpush3.msra.mxu0 %v219_v52  ;;  %1014 = vmatpush3.msra.mxu1 %v1149_v35 }
  0x62   :  { %988 = vmatprep.subr.mxu0 %v1032_v3  ;;  %1015 = vmatprep.subr.mxu1 %v1032_v3 }
  0x63   :  { %989 = vmatpush3.msra.mxu0 %v226_v0  ;;  %1016 = vmatpush3.msra.mxu1 %v1170_v45 }
  0x64   :  { %990 = vmatprep.subr.mxu0 %v1032_v3  ;;  %1017 = vmatprep.subr.mxu1 %v1032_v3 }
  0x65   :  { %991 = vmatpush3.msra.mxu0 %v233_v9  ;;  %992 = vmatprep.mubr.msk.f32.mxu0 %vm1033_vm0, %v1032_v3 }
  0x66   :  { %1018 = vmatpush3.msra.mxu1 %v1178_v48  ;;  %993 = vmatmul.mubr.f32.vlgmr.msra.gmra.mxu0 %v1212_v62 }
  0x67   :  { %1019 = vmatprep.subr.mxu1 %v1032_v3  ;;  %1027 = vmatprep.mubr.msk.f32.mxu1 %vm1033_vm0, %v1032_v3 }
  0x68   :  { %1020 = vmatpush3.msra.mxu1 %v1204_v59 }
  0x69   :  { %1021 = vmatprep.subr.mxu1 %v1032_v3 }
  0x6a   :  { %1022 = vmatpush3.msra.mxu1 %v1216_v63 }
  0x6b   :  { %1023 = vmatprep.subr.mxu1 %v1032_v3 }
  0x6c   :  { %1024 = vmatpush3.msra.mxu1 %v1234_v13 }
  0x6d   :  { %1025 = vmatprep.subr.mxu1 %v1032_v3 }
  0x6e   :  { %1026 = vmatpush3.msra.mxu1 %v1246_v32 }
  0x6f   :  { %1028 = vmatmul.mubr.f32.vlgmr.msra.gmra.mxu1 %v1212_v62 }
  0xe4   :  { %v121_v4 = vpop.f32.mrf.mxu0 }
  0xe5   :  { %v122_v18 = vadd.f32 %v121_v4, %v33_v17 }
  0xe6   :  { %v854_v5 = vpop.f32.mrf.mxu0 }
  0xeb   :  { %v272_v6 = vpop.f32.mrf.mxu1 }
  0xec   :  { %v273_v21 = vadd.f32 %v272_v6, %v122_v18 }
  0xed   :  { %v889_v10 = vpop.f32.mrf.mxu1 }
 0x104   :  { %v376_v11 = vpop.f32.mrf.mxu0 }
 0x105   :  { %v377_v22 = vadd.f32 %v376_v11, %v273_v21 }
 0x106   :  { %v924_v12 = vpop.f32.mrf.mxu0 }
 0x10d   :  { %v465_v15 = vpop.f32.mrf.mxu1 }
 0x10e   :  { %v466_v23 = vadd.f32 %v465_v15, %v377_v22 }
 0x10f   :  { %v959_v16 = vpop.f32.mrf.mxu1 }
 0x126   :  { %v584_v20 = vpop.f32.mrf.mxu0 }
 0x127   :  { %v585_v24 = vadd.f32 %v584_v20, %v466_v23 }
 0x128   :  { %v994_v3 = vpop.f32.mrf.mxu0 }
 0x12f   :  { %v671_v25 = vpop.f32.mrf.mxu1 }
 0x130   :  { %v672_v27 = vadd.f32 %v671_v25, %v585_v24 }
 0x131   :  { %v1029_v28 = vpop.f32.mrf.mxu1 }
 0x132   :  { %676 = vst.msk [vmem:[#allocation3] sm:$0xff] %vm675_vm1, %v672_v27 }
 0x139   :  { %v695_v29 = vld [vmem:[#allocation3] sm:$0x3] }
 0x13a   :  { %696 = vst [vmem:[%s1477_s3] sm:$0x3] %v695_v29 }

</bundles_post_ra>
